<compile_context>
chip_gen: v7x
topology: tpu7x:2x2x1
jax: 0.10.0
libtpu: 0.0.40
codegen_flags: <defaults>
</compile_context>

<pallas_src>
import jax
import jax.numpy as jnp
from jax.experimental import pallas as pl
from jax.experimental.pallas import tpu as pltpu


IN_FEATURES = 291
HIDDEN = 12
OUT_FEATURES = 1

# Below this, the ~0.35 us per-grid-step overhead dominates; use one block.
_MIN_ROWS_PER_STEP = 1024


def _round_up(n, m):
    return ((n + m - 1) // m) * m


def _chip_tiling():
    """(tile_cap, target_grid_steps) per TPU generation.

    v7x: 2 TensorCores + 3.2 TB/s HBM but only 64 MiB physical VMEM -> cap 4096
    (double/triple-buffered x tile ~9 MiB, lane-padded 291->384) and aim for
    >=4 grid steps so both cores get pipelined work.
    v5e/v6e: single TensorCore -> just take the biggest tile up to 2048, which
    already reaches ~90% of the v5e/v6e HBM roofline and stays well inside
    v5e's 16 MiB scoped-VMEM default (with vmem_limit raised to 32 MiB).
    """
    try:
        kind = jax.devices()[0].device_kind.lower()
    except Exception:
        kind = ""
    if "7" in kind:          # v7x family
        return 4096, 4
    return 2048, 1


def _choose_tile(B):
    cap, target_steps = _chip_tiling()
    if B <= _MIN_ROWS_PER_STEP:
        return B                                    # single full-batch block
    if target_steps <= 1:
        return B if B <= cap else cap               # single-TC: biggest tile wins
    # v7x: split so both TensorCores get >=2 pipelined steps, but keep each
    # step big enough to amortize per-step overhead and under the VMEM cap.
    target = _round_up(pl.cdiv(B, target_steps), 8)
    return max(_MIN_ROWS_PER_STEP, min(cap, target))


def _x_spec(tb, num_steps):
    idx = lambda i: (i, 0)
    # Triple-buffer the dominant (x) stream so two DMAs stay in flight.
    if num_steps >= 2 and hasattr(pl, "Buffered"):
        try:
            return pl.BlockSpec((tb, IN_FEATURES), idx,
                                pipeline_mode=pl.Buffered(3))
        except TypeError:
            pass
    return pl.BlockSpec((tb, IN_FEATURES), idx)


def _mlp_kernel(x_ref, w1_ref, b1_ref, w2_ref, b2_ref, o_ref):
    # x_ref:  [TB, 291]
    # w1_ref: [291, 12]   b1_ref: [1, 12]
    # w2_ref: [1, 12]     b2_ref: [1, 1]
    # o_ref:  [TB, 1]
    h = jnp.dot(x_ref[...], w1_ref[...], preferred_element_type=jnp.float32)
    h = jnp.maximum(h + b1_ref[...], 0.0)                      # ReLU
    # fc2 has N=1: keep it off the MXU push/pop path — broadcast-mul against
    # the [1,12] weight row and reduce on the XLU slot instead.
    y = jnp.sum(h * w2_ref[...], axis=-1, keepdims=True) + b2_ref[...]
    o_ref[...] = jax.nn.sigmoid(y)                              # sigmoid (EUP)


def offer_net(x, w1_t, b1, w2_row, b2):
    """Forward pass.

    x:      [B, 291] f32
    w1_t:   [291, 12] f32 (fc1 weight, transposed to [in, out])
    b1:     [1, 12]   f32
    w2_row: [1, 12]   f32 (fc2 weight in PyTorch [out, in] layout)
    b2:     [1, 1]    f32
    Returns [B, 1] f32.
    """
    B, F = x.shape
    assert F == IN_FEATURES

    tb = _choose_tile(B)
    num_steps = pl.cdiv(B, tb)

    cost = pl.CostEstimate(
        flops=2 * B * (IN_FEATURES * HIDDEN + HIDDEN * OUT_FEATURES),
        transcendentals=2 * B,  # sigmoid ~ exp + reciprocal per element
        bytes_accessed=4 * (
            B * IN_FEATURES + B * OUT_FEATURES
            + IN_FEATURES * HIDDEN + HIDDEN
            + HIDDEN + OUT_FEATURES
        ),
    )

    return pl.pallas_call(
        _mlp_kernel,
        out_shape=jax.ShapeDtypeStruct((B, OUT_FEATURES), jnp.float32),
        grid_spec=pltpu.PrefetchScalarGridSpec(
            num_scalar_prefetch=0,
            grid=(num_steps,),
            in_specs=[
                _x_spec(tb, num_steps),
                pl.BlockSpec((IN_FEATURES, HIDDEN), lambda i: (0, 0)),
                pl.BlockSpec((1, HIDDEN), lambda i: (0, 0)),
                pl.BlockSpec((1, HIDDEN), lambda i: (0, 0)),
                pl.BlockSpec((1, OUT_FEATURES), lambda i: (0, 0)),
            ],
            out_specs=pl.BlockSpec((tb, OUT_FEATURES), lambda i: (i, 0)),
        ),
        compiler_params=pltpu.CompilerParams(
            dimension_semantics=("parallel",),
            vmem_limit_bytes=32 * 1024 * 1024,
        ),
        cost_estimate=cost,
    )(x, w1_t, b1, w2_row, b2)


def init_params(key):
    """nn.Linear-style init (uniform +-1/sqrt(fan_in)), laid out once for the
    kernel so the per-call path does zero data prep."""
    k1, k2, k3, k4 = jax.random.split(key, 4)
    bound1 = 1.0 / jnp.sqrt(jnp.float32(IN_FEATURES))
    bound2 = 1.0 / jnp.sqrt(jnp.float32(HIDDEN))
    w1 = jax.random.uniform(k1, (HIDDEN, IN_FEATURES), jnp.float32, -bound1, bound1)
    b1 = jax.random.uniform(k2, (HIDDEN,), jnp.float32, -bound1, bound1)
    w2 = jax.random.uniform(k3, (OUT_FEATURES, HIDDEN), jnp.float32, -bound2, bound2)
    b2 = jax.random.uniform(k4, (OUT_FEATURES,), jnp.float32, -bound2, bound2)
    return (
        jnp.asarray(w1.T),                  # [291, 12]  fc1 weight, [in, out]
        b1.reshape(1, HIDDEN),              # [1, 12]
        jnp.asarray(w2),                    # [1, 12]    fc2 weight row ([out, in])
        b2.reshape(1, OUT_FEATURES),        # [1, 1]
    )


def _reference(x, w1_t, b1, w2_row, b2):
    h = jnp.maximum(x @ w1_t + b1, 0.0)
    return jax.nn.sigmoid(h @ w2_row.T + b2)


if __name__ == "__main__":
    key = jax.random.PRNGKey(0)
    kx, kp = jax.random.split(key)
    B = 2
    x = jax.random.normal(kx, (B, IN_FEATURES), jnp.float32)
    w1_t, b1, w2_row, b2 = init_params(kp)

    out = offer_net(x, w1_t, b1, w2_row, b2)
    out = jax.block_until_ready(out)

    ref = _reference(x, w1_t, b1, w2_row, b2)
    assert out.shape == (B, OUT_FEATURES), out.shape
    assert jnp.allclose(out, ref, atol=1e-5, rtol=1e-5), (out, ref)

    print("KERNEL_OK")
</pallas_src>

<mosaic_0001>
module attributes {stable_mosaic.version = 11 : i64} {
  func.func @_mlp_kernel(%arg0: i32, %arg1: memref<2x291xf32, #tpu.memory_space<vmem>>, %arg2: memref<291x12xf32, #tpu.memory_space<vmem>>, %arg3: memref<1x12xf32, #tpu.memory_space<vmem>>, %arg4: memref<1x12xf32, #tpu.memory_space<vmem>>, %arg5: memref<1x1xf32, #tpu.memory_space<vmem>>, %arg6: memref<2x1xf32, #tpu.memory_space<vmem>>) attributes {dimension_semantics = [#tpu.dimension_semantics<parallel>], iteration_bounds = array<i64: 1>, scalar_prefetch = 0 : i64, scratch_operands = 0 : i64, tpu.core_type = #tpu.core_type<tc>, window_params = [{transform_indices = @transform_0, window_bounds = array<i64: 2, 291>}, {pipeline_mode = #tpu.pipeline_mode<synchronous>, transform_indices = @transform_1, window_bounds = array<i64: 291, 12>}, {pipeline_mode = #tpu.pipeline_mode<synchronous>, transform_indices = @transform_2, window_bounds = array<i64: 1, 12>}, {pipeline_mode = #tpu.pipeline_mode<synchronous>, transform_indices = @transform_3, window_bounds = array<i64: 1, 12>}, {pipeline_mode = #tpu.pipeline_mode<synchronous>, transform_indices = @transform_4, window_bounds = array<i64: 1, 1>}, {transform_indices = @transform_5, window_bounds = array<i64: 2, 1>}]} {
    %c0 = arith.constant 0 : index
    %c0_0 = arith.constant 0 : index
    %0 = vector.load %arg1[%c0, %c0_0] : memref<2x291xf32, #tpu.memory_space<vmem>>, vector<2x291xf32>
    %c0_1 = arith.constant 0 : index
    %c0_2 = arith.constant 0 : index
    %1 = vector.load %arg2[%c0_1, %c0_2] : memref<291x12xf32, #tpu.memory_space<vmem>>, vector<291x12xf32>
    %cst = arith.constant dense<0.000000e+00> : vector<2x12xf32>
    %2 = tpu.matmul %0, %1, %cst {dimension_numbers = #tpu.dot_dimension_numbers<[1], [0], [0], [1], [0, 0, 1, 1], [], []>} : vector<2x291xf32>, vector<291x12xf32>, vector<2x12xf32> -> vector<2x12xf32>
    %c0_3 = arith.constant 0 : index
    %c0_4 = arith.constant 0 : index
    %3 = vector.load %arg3[%c0_3, %c0_4] : memref<1x12xf32, #tpu.memory_space<vmem>>, vector<1x12xf32>
    %4 = vector.broadcast %3 : vector<1x12xf32> to vector<2x12xf32>
    %5 = arith.addf %2, %4 : vector<2x12xf32>
    %cst_5 = arith.constant 0.000000e+00 : f32
    %6 = vector.broadcast %cst_5 : f32 to vector<2x12xf32>
    %7 = arith.maximumf %5, %6 : vector<2x12xf32>
    %c0_6 = arith.constant 0 : index
    %c0_7 = arith.constant 0 : index
    %8 = vector.load %arg4[%c0_6, %c0_7] : memref<1x12xf32, #tpu.memory_space<vmem>>, vector<1x12xf32>
    %9 = vector.broadcast %8 : vector<1x12xf32> to vector<2x12xf32>
    %10 = arith.mulf %7, %9 : vector<2x12xf32>
    %cst_8 = arith.constant dense<0.000000e+00> : vector<2xf32>
    %11 = vector.multi_reduction <add>, %10, %cst_8 [1] : vector<2x12xf32> to vector<2xf32>
    %12 = vector.shape_cast %11 : vector<2xf32> to vector<2x1xf32>
    %c0_9 = arith.constant 0 : index
    %c0_10 = arith.constant 0 : index
    %13 = vector.load %arg5[%c0_9, %c0_10] : memref<1x1xf32, #tpu.memory_space<vmem>>, vector<1x1xf32>
    %14 = vector.broadcast %13 : vector<1x1xf32> to vector<2x1xf32>
    %15 = arith.addf %12, %14 : vector<2x1xf32>
    %16 = arith.negf %15 : vector<2x1xf32>
    %17 = math.exp %16 : vector<2x1xf32>
    %cst_11 = arith.constant 1.000000e+00 : f32
    %18 = vector.broadcast %cst_11 : f32 to vector<2x1xf32>
    %19 = arith.addf %18, %17 : vector<2x1xf32>
    %20 = arith.divf %18, %19 : vector<2x1xf32>
    %c0_12 = arith.constant 0 : index
    %c0_13 = arith.constant 0 : index
    %21 = vector.load %arg6[%c0_12, %c0_13] : memref<2x1xf32, #tpu.memory_space<vmem>>, vector<2x1xf32>
    tpu.vector_store %arg6[%c0_12, %c0_13], %20 {strides = array<i32>} : memref<2x1xf32, #tpu.memory_space<vmem>>, vector<2x1xf32>,
    return
  }
  func.func @transform_0(%arg0: i32) -> (i32, i32) {
    %c0_i32 = arith.constant 0 : i32
    %c0_i32_0 = arith.constant 0 : i32
    return %arg0, %c0_i32 : i32, i32
  }
  func.func @transform_1(%arg0: i32) -> (i32, i32) {
    %c0_i32 = arith.constant 0 : i32
    %c0_i32_0 = arith.constant 0 : i32
    %c0_i32_1 = arith.constant 0 : i32
    return %c0_i32, %c0_i32_0 : i32, i32
  }
  func.func @transform_2(%arg0: i32) -> (i32, i32) {
    %c0_i32 = arith.constant 0 : i32
    %c0_i32_0 = arith.constant 0 : i32
    %c0_i32_1 = arith.constant 0 : i32
    return %c0_i32, %c0_i32_0 : i32, i32
  }
  func.func @transform_3(%arg0: i32) -> (i32, i32) {
    %c0_i32 = arith.constant 0 : i32
    %c0_i32_0 = arith.constant 0 : i32
    %c0_i32_1 = arith.constant 0 : i32
    return %c0_i32, %c0_i32_0 : i32, i32
  }
  func.func @transform_4(%arg0: i32) -> (i32, i32) {
    %c0_i32 = arith.constant 0 : i32
    %c0_i32_0 = arith.constant 0 : i32
    %c0_i32_1 = arith.constant 0 : i32
    return %c0_i32, %c0_i32_0 : i32, i32
  }
  func.func @transform_5(%arg0: i32) -> (i32, i32) {
    %c0_i32 = arith.constant 0 : i32
    %c0_i32_0 = arith.constant 0 : i32
    return %arg0, %c0_i32 : i32, i32
  }
}

</mosaic_0001>

<bundles_post_ra>
// kernel: tpu_custom_call.1
= control target key start
LH: loop header
LB: loop body
LE: loop exit
PB: predicated region body
PF: predicated region fallthrough
CT: control target
= control target key end

     0   :  { %v373_v3 = vmov 0.0|0.0   ;;  %v374_v4 = vmov 1983009808   ;;  %v72_v6 = vlaneseq  ;;  %vm375_vm0 = vmmov 0   ;;  %s533_s1 = inlined_call_operand.vmem [shape: f32[291,12], index: 1, kind: input, shape index: {}]   ;;  %s534_s0 = inlined_call_operand.vmem [shape: f32[2,291], index: 0, kind: input, shape index: {}]   ;;  %s535_s4 = inlined_call_operand.<no memory space> [shape: f32[1,1], index: 4, kind: input, shape index: {}]   ;;  %s536_s2 = inlined_call_operand.vmem [shape: f32[1,12], index: 2, kind: input, shape index: {}]   ;;  %s537_s3 = inlined_call_operand.vmem [shape: f32[1,12], index: 3, kind: input, shape index: {}]   ;;  %s538_s5 = inlined_call_operand.vmem [shape: f32[2,1], index: 5, kind: output, shape index: {}]  }
   0x1   :  { %v39_v0 = vld [vmem:[%s533_s1 + $0x80] sm:$0xff]  ;;  %v40_v1 = vld [vmem:[%s533_s1 + $0x88] sm:$0xff]  ;;  %358 = vmatprep.subr.bf16.mxu1 %v373_v3  ;;  %v70_v5 = vunpack.c.l.s4 %v374_v4  ;;  %v41_v9 = vld [vmem:[%s533_s1 + $0x90] sm:$0xff]  ;;  %v376_v11 = vmov 0.0   ;;  %vm89_vm1 = vcmask 1042432   ;;  %vm86_vm2 = vcmask 285696  }
   0x2   :  { %v23_v2 = vld [vmem:[%s533_s1] sm:$0xff]  ;;  %v326_v7 = vpack.c.bf16 %v40_v1, %v39_v0  ;;  %v24_v8 = vld [vmem:[%s533_s1 + $0x8] sm:$0xff]  ;;  %v42_v10 = vld [vmem:[%s533_s1 + $0x98] sm:$0xff]  ;;  %323 = vmatprep.mubr.msk.f32.mxu1 %vm375_vm0, %v376_v11  ;;  %v73_v20 = vshrl.u32 %v72_v6, 7  ;;  %v10_v4 = vstv %s535_s4  ;;  %vm242_vm3 = vcmask 91136  }
   0x3   :  { %v328_v12 = vpack.c.bf16 %v24_v8, %v23_v2  ;;  %v330_v13 = vpack.c.bf16 %v42_v10, %v41_v9  ;;  %v25_v14 = vld [vmem:[%s533_s1 + $0x10] sm:$0xff]  ;;  %v26_v15 = vld [vmem:[%s533_s1 + $0x18] sm:$0xff]  ;;  %v43_v16 = vld [vmem:[%s533_s1 + $0xa0] sm:$0xff]  ;;  %v71_v19 = vunpack.c.0.s8 %v70_v5  ;;  %11 = vst [vmem:[#allocation2] sm:$0x1] %v10_v4  ;;  %vm260_vm4 = vcmask 1024  }
   0x4   :  { %327 = vmatprep.subr.bf16.mxu0 %v326_v7  ;;  %v44_v17 = vld [vmem:[%s533_s1 + $0xa8] sm:$0xff]  ;;  %v332_v18 = vpack.c.bf16 %v26_v15, %v25_v14  ;;  %v27_v22 = vld [vmem:[%s533_s1 + $0x20] sm:$0xff]  ;;  %v45_v24 = vld [vmem:[%s533_s1 + $0xb0] sm:$0xff] }
   0x5   :  { %329 = vmatpush3.bf16.msra.mxu0 %v328_v12  ;;  %v334_v21 = vpack.c.bf16 %v44_v17, %v43_v16  ;;  %v28_v23 = vld [vmem:[%s533_s1 + $0x28] sm:$0xff]  ;;  %v46_v25 = vld [vmem:[%s533_s1 + $0xb8] sm:$0xff]  ;;  %v29_v27 = vld [vmem:[%s533_s1 + $0x30] sm:$0xff]  ;;  %v74_v28 = vsub.s32 %v71_v19, %v73_v20 }
   0x6   :  { %331 = vmatprep.subr.bf16.mxu0 %v330_v13  ;;  %v336_v26 = vpack.c.bf16 %v28_v23, %v27_v22  ;;  %v338_v29 = vpack.c.bf16 %v46_v25, %v45_v24  ;;  %v30_v30 = vld [vmem:[%s533_s1 + $0x38] sm:$0xff]  ;;  %v55_v31 = vld [vmem:[%s533_s1 + $0x100] sm:$0xff]  ;;  %v56_v32 = vld [vmem:[%s533_s1 + $0x108] sm:$0xff] }
   0x7   :  { %v47_v33 = vld [vmem:[%s533_s1 + $0xc0] sm:$0xff]  ;;  %v48_v34 = vld [vmem:[%s533_s1 + $0xc8] sm:$0xff]  ;;  %v359_v35 = vpack.c.bf16 %v56_v32, %v55_v31  ;;  %v57_v37 = vld [vmem:[%s533_s1 + $0x110] sm:$0xff]  ;;  %v340_v38 = vpack.c.bf16 %v30_v30, %v29_v27 }
   0x8   :  { %v22_v36 = vld [vmem:[%s534_s0] sm:$0x3f]  ;;  %v58_v40 = vld [vmem:[%s533_s1 + $0x118] sm:$0xff]  ;;  %v342_v41 = vpack.c.bf16 %v48_v34, %v47_v33  ;;  %v32_v43 = vld [vmem:[%s533_s1 + $0x48] sm:$0xff] }
   0x9   :  { %333 = vmatpush3.bf16.msra.mxu0 %v332_v18  ;;  %360 = vmatpush3.bf16.msra.mxu1 %v359_v35  ;;  %v75_v39 = vrot.slane %v22_v36, %v74_v28  ;;  %v31_v42 = vld [vmem:[%s533_s1 + $0x40] sm:$0xff]  ;;  %v362_v44 = vpack.c.bf16 %v58_v40, %v57_v37  ;;  %v49_v45 = vld [vmem:[%s533_s1 + $0xd0] sm:$0xff]  ;;  %v50_v46 = vld [vmem:[%s533_s1 + $0xd8] sm:$0xff]  ;;  %v68_v47 = vcombine.high %v22_v36, %v22_v36 }
   0xa   :  { %335 = vmatprep.subr.bf16.mxu0 %v334_v21  ;;  %361 = vmatprep.subr.bf16.mxu1 %v373_v3  ;;  %v344_v49 = vpack.c.bf16 %v32_v43, %v31_v42  ;;  %v346_v50 = vpack.c.bf16 %v50_v46, %v49_v45  ;;  %v33_v51 = vld [vmem:[%s533_s1 + $0x50] sm:$0xff]  ;;  %v34_v52 = vld [vmem:[%s533_s1 + $0x58] sm:$0xff]  ;;  %v51_v53 = vld [vmem:[%s533_s1 + $0xe0] sm:$0xff] }
   0xb   :  { %v83_v48 = vcombine.high %v75_v39, %v75_v39  ;;  %v52_v54 = vld [vmem:[%s533_s1 + $0xe8] sm:$0xff]  ;;  %v82_v55 = vrot.slane %v68_v47, %v74_v28  ;;  %v59_v56 = vld [vmem:[%s533_s1 + $0x120] sm:$0x7]  ;;  %v348_v57 = vpack.c.bf16 %v34_v52, %v33_v51  ;;  %v53_v61 = vld [vmem:[%s533_s1 + $0xf0] sm:$0xff] }
   0xc   :  { %v350_v58 = vpack.c.bf16 %v52_v54, %v51_v53  ;;  %v35_v59 = vld [vmem:[%s533_s1 + $0x60] sm:$0xff]  ;;  %v36_v60 = vld [vmem:[%s533_s1 + $0x68] sm:$0xff]  ;;  %v54_v62 = vld [vmem:[%s533_s1 + $0xf8] sm:$0xff] }
   0xd   :  { %337 = vmatpush3.bf16.msra.mxu0 %v336_v26  ;;  %157 = vmatprep.mubr.f32.mxu0 %v83_v48  ;;  %v352_v63 = vpack.c.bf16 %v36_v60, %v35_v59  ;;  %v354_v0 = vpack.c.bf16 %v54_v62, %v53_v61  ;;  %v37_v1 = vld [vmem:[%s533_s1 + $0x70] sm:$0xff]  ;;  %v38_v2 = vld [vmem:[%s533_s1 + $0x78] sm:$0xff]  ;;  %v266_v9 = vld [vmem:[%s536_s2] ss:$0 sm:$0xff] }
   0xe   :  { %339 = vmatprep.subr.bf16.mxu0 %v338_v29  ;;  %363 = vmatpush3.bf16.msra.mxu1 %v362_v44  ;;  %v356_v3 = vpack.c.bf16 %v38_v2, %v37_v1  ;;  %v269_v13 = vld [vmem:[%s537_s3] ss:$0 sm:$0xff] }
   0xf   :  { %321 = vmatprep.subr.mxu1 %v376_v11  ;;  %v270_v17 = vld [vmem:[#allocation2] ss:$0 sm:$0xff] }
  0x11   :  { %341 = vmatpush3.bf16.msra.mxu0 %v340_v38 }
  0x12   :  { %343 = vmatprep.subr.bf16.mxu0 %v342_v41  ;;  %322 = vmatpush3.msk.msra.mxu1 %vm89_vm1, %v59_v56 }
  0x13   :  { %324 = vmatmul.mubr.msk.f32.vlgmr.msra.gmra.mrb[0].mxu1 %vm86_vm2, %v82_v55 }
  0x15   :  { %345 = vmatpush3.bf16.msra.mxu0 %v344_v49 }
  0x16   :  { %347 = vmatprep.subr.bf16.mxu0 %v346_v50 }
  0x19   :  { %349 = vmatpush3.bf16.msra.mxu0 %v348_v57 }
  0x1a   :  { %351 = vmatprep.subr.bf16.mxu0 %v350_v58 }
  0x1d   :  { %353 = vmatpush3.bf16.msra.mxu0 %v352_v63 }
  0x1e   :  { %355 = vmatprep.subr.bf16.mxu0 %v354_v0 }
  0x21   :  { %357 = vmatpush3.bf16.msra.mxu0 %v356_v3 }
  0x24   :  { %158 = vmatmul.mubr.f32.vlgmr.msra.gmra.mrb[0].mxu0 %v75_v39 }
  0xe6   :  { %v229_v5 = vpop.f32.mrb[0].mxu1 }
  0xe7   :  { %v325_v6 = vpop.f32.mrb[1].mxu1 }
  0xf7   :  { %v304_v7 = vpop.f32.mrb[0].mxu0 }
  0xf8   :  { %v305_v8 = vpop.f32.mrb[1].mxu0 }
  0xf9   :  { %v306_v10 = vadd.f32 %v305_v8, %v304_v7 }
  0xfb   :  { %v160_v11 = vadd.f32 %v306_v10, %v266_v9 }
  0xfd   :  { %v230_v12 = vadd.f32 %v229_v5, %v160_v11 }
  0xff   :  { %v233_v14 = vmax.f32 %v230_v12, 0.0 }
 0x101   :  { %v241_v15 = vmul.f32 %v269_v13, %v233_v14 }
 0x103   :  { %v243_v16 = vsel %vm242_vm3, %v241_v15, 0.0 }
 0x104   :  { %244 = vadd.xlane.f32.xlu0 %v243_v16 }
 0x191   :  { %v245_v18 = vpop.xlane.xlu0 %244 }
 0x192   :  { %v253_v19 = vadd.f32 %v270_v17, %v245_v18 }
 0x194   :  { %v271_v20 = vmul.f32 -1.442695, %v253_v19 }
 0x196   :  { %369 = vpow2.f32 %v271_v20 }
 0x1a0   :  { %v370_v21 = vpop.eup %369 }
 0x1a1   :  { %v257_v22 = vadd.f32 1.0, %v370_v21 }
 0x1a3   :  { %371 = vrcp.f32 %v257_v22 }
 0x1ad   :  { %v372_v23 = vpop.eup %371 }
 0x1ae   :  { %261 = vst.msk [vmem:[%s538_s5] sm:$0x3] %vm260_vm4, %v372_v23 }

</bundles_post_ra>
